<compile_context>
chip_gen: v5e
topology: v5e:2x2
jax: 0.10.0
libtpu: 0.0.40
codegen_flags: <defaults>
</compile_context>

<pallas_src>
import jax
import jax.numpy as jnp
from jax.experimental import pallas as pl
from jax.experimental.pallas import tpu as pltpu

IN_F, H1, H2, OUT_F = 200, 5, 10, 100


def fcnn_kernel(x_ref, w1_ref, b1_ref, w2_ref, b2_ref, w3_ref, b3_ref, o_ref):
    x = x_ref[...].astype(jnp.float32)                                  # (TB, 200)
    h1 = jnp.dot(x, w1_ref[...], preferred_element_type=jnp.float32) + b1_ref[...]
    h1 = jnp.maximum(h1, 0.0)                                           # (TB, 5)
    h2 = jnp.dot(h1, w2_ref[...], preferred_element_type=jnp.float32) + b2_ref[...]
    h2 = jnp.maximum(h2, 0.0)                                           # (TB, 10)
    out = jnp.dot(h2, w3_ref[...], preferred_element_type=jnp.float32) + b3_ref[...]
    o_ref[...] = out.astype(o_ref.dtype)                                # (TB, 100)


def fcnn_forward(x, params, *, block_b=2048):
    """x: any shape (B, ...) flattening to (B, 200). Returns (B, 100) float32."""
    B = x.shape[0]
    x2d = x.reshape(B, -1)          # glue: torch's x.view(B, -1); no dtype copy here
    assert x2d.shape[1] == IN_F, f"expected {IN_F} flattened features, got {x2d.shape[1]}"

    w1, b1, w2, b2, w3, b3 = params
    # Biases as (1, N) so they broadcast over the batch tile in VMEM.
    b1 = b1.reshape(1, H1)
    b2 = b2.reshape(1, H2)
    b3 = b3.reshape(1, OUT_F)

    # Batch tile: multiple of 16 sublanes (safe for f32 and bf16), capped at block_b.
    TB = min(block_b, ((B + 15) // 16) * 16)
    TB = ((TB + 15) // 16) * 16
    n_tiles = pl.cdiv(B, TB)
    Bp = n_tiles * TB
    if Bp != B:
        x2d = jnp.pad(x2d, ((0, Bp - B), (0, 0)))

    def const(shape):
        return pl.BlockSpec(shape, lambda i: (0, 0))

    flops = 2 * Bp * (IN_F * H1 + H1 * H2 + H2 * OUT_F)
    bytes_accessed = (
        Bp * IN_F * x2d.dtype.itemsize                 # input stream
        + Bp * OUT_F * 4                               # output stream
        + 4 * (IN_F * H1 + H1 + H1 * H2 + H2 + H2 * OUT_F + OUT_F)  # weights (once)
    )

    out = pl.pallas_call(
        fcnn_kernel,
        out_shape=jax.ShapeDtypeStruct((Bp, OUT_F), jnp.float32),
        grid=(n_tiles,),
        in_specs=[
            pl.BlockSpec((TB, IN_F), lambda i: (i, 0)),   # streamed batch tile
            const((IN_F, H1)), const((1, H1)),            # fc1 (VMEM-resident)
            const((H1, H2)), const((1, H2)),              # fc2
            const((H2, OUT_F)), const((1, OUT_F)),        # fc3
        ],
        out_specs=pl.BlockSpec((TB, OUT_F), lambda i: (i, 0)),
        compiler_params=pltpu.CompilerParams(
            dimension_semantics=("parallel",),            # megacore-friendly on v7x
        ),
        cost_estimate=pl.CostEstimate(
            flops=flops, transcendentals=0, bytes_accessed=bytes_accessed),
    )(x2d, w1, b1, w2, b2, w3, b3)

    return out[:B] if Bp != B else out


def init_params(key):
    """Deterministic init mimicking PyTorch nn.Linear defaults:
    weights & biases ~ U(-1/sqrt(fan_in), 1/sqrt(fan_in)).
    Weights returned as (in_features, out_features)."""
    def linear(key, fan_in, fan_out):
        kw, kb = jax.random.split(key)
        bound = 1.0 / jnp.sqrt(fan_in)
        w = jax.random.uniform(kw, (fan_in, fan_out), jnp.float32, -bound, bound)
        b = jax.random.uniform(kb, (fan_out,), jnp.float32, -bound, bound)
        return w, b

    k1, k2, k3 = jax.random.split(key, 3)
    w1, b1 = linear(k1, IN_F, H1)
    w2, b2 = linear(k2, H1, H2)
    w3, b3 = linear(k3, H2, OUT_F)
    return (w1, b1, w2, b2, w3, b3)


def fcnn_reference(x, params):
    """Pure-JAX reference for correctness check."""
    w1, b1, w2, b2, w3, b3 = params
    h = x.reshape(x.shape[0], -1).astype(jnp.float32)
    h = jnp.maximum(h @ w1 + b1, 0.0)
    h = jnp.maximum(h @ w2 + b2, 0.0)
    return h @ w3 + b3


if __name__ == "__main__":
    key = jax.random.PRNGKey(0)
    kx, kp = jax.random.split(key)

    # Input consistent with the forward's flatten-to-200: (B=2, C=2, H=10, W=10).
    x = jax.random.normal(kx, (2, 2, 10, 10), dtype=jnp.float32)
    params = init_params(kp)

    out = fcnn_forward(x, params)
    out = jax.block_until_ready(out)

    ref = fcnn_reference(x, params)
    assert out.shape == (2, 100)
    assert jnp.allclose(out, ref, atol=1e-5, rtol=1e-5), "mismatch vs reference"

    # Also exercise a multi-tile batch (crosses the grid / padding path).
    xb = jax.random.normal(kx, (300, 2, 10, 10), dtype=jnp.float32)
    outb = jax.block_until_ready(fcnn_forward(xb, params, block_b=128))
    refb = fcnn_reference(xb, params)
    assert outb.shape == (300, 100)
    assert jnp.allclose(outb, refb, atol=1e-5, rtol=1e-5), "mismatch vs reference (tiled)"

    print("KERNEL_OK")
</pallas_src>

<mosaic_0001>
module attributes {stable_mosaic.version = 11 : i64} {
  func.func @fcnn_kernel(%arg0: i32, %arg1: memref<16x200xf32, #tpu.memory_space<vmem>>, %arg2: memref<200x5xf32, #tpu.memory_space<vmem>>, %arg3: memref<1x5xf32, #tpu.memory_space<vmem>>, %arg4: memref<5x10xf32, #tpu.memory_space<vmem>>, %arg5: memref<1x10xf32, #tpu.memory_space<vmem>>, %arg6: memref<10x100xf32, #tpu.memory_space<vmem>>, %arg7: memref<1x100xf32, #tpu.memory_space<vmem>>, %arg8: memref<16x100xf32, #tpu.memory_space<vmem>>) attributes {dimension_semantics = [#tpu.dimension_semantics<parallel>], iteration_bounds = array<i64: 1>, scalar_prefetch = 0 : i64, scratch_operands = 0 : i64, tpu.core_type = #tpu.core_type<tc>, window_params = [{transform_indices = @transform_0, window_bounds = array<i64: 16, 200>}, {pipeline_mode = #tpu.pipeline_mode<synchronous>, transform_indices = @transform_1, window_bounds = array<i64: 200, 5>}, {pipeline_mode = #tpu.pipeline_mode<synchronous>, transform_indices = @transform_2, window_bounds = array<i64: 1, 5>}, {pipeline_mode = #tpu.pipeline_mode<synchronous>, transform_indices = @transform_3, window_bounds = array<i64: 5, 10>}, {pipeline_mode = #tpu.pipeline_mode<synchronous>, transform_indices = @transform_4, window_bounds = array<i64: 1, 10>}, {pipeline_mode = #tpu.pipeline_mode<synchronous>, transform_indices = @transform_5, window_bounds = array<i64: 10, 100>}, {pipeline_mode = #tpu.pipeline_mode<synchronous>, transform_indices = @transform_6, window_bounds = array<i64: 1, 100>}, {transform_indices = @transform_7, window_bounds = array<i64: 16, 100>}]} {
    %c0 = arith.constant 0 : index
    %c0_0 = arith.constant 0 : index
    %0 = vector.load %arg1[%c0, %c0_0] : memref<16x200xf32, #tpu.memory_space<vmem>>, vector<16x200xf32>
    %c0_1 = arith.constant 0 : index
    %c0_2 = arith.constant 0 : index
    %1 = vector.load %arg2[%c0_1, %c0_2] : memref<200x5xf32, #tpu.memory_space<vmem>>, vector<200x5xf32>
    %cst = arith.constant dense<0.000000e+00> : vector<16x5xf32>
    %2 = tpu.matmul %0, %1, %cst {dimension_numbers = #tpu.dot_dimension_numbers<[1], [0], [0], [1], [0, 0, 1, 1], [], []>} : vector<16x200xf32>, vector<200x5xf32>, vector<16x5xf32> -> vector<16x5xf32>
    %c0_3 = arith.constant 0 : index
    %c0_4 = arith.constant 0 : index
    %3 = vector.load %arg3[%c0_3, %c0_4] : memref<1x5xf32, #tpu.memory_space<vmem>>, vector<1x5xf32>
    %4 = vector.broadcast %3 : vector<1x5xf32> to vector<16x5xf32>
    %5 = arith.addf %2, %4 : vector<16x5xf32>
    %cst_5 = arith.constant 0.000000e+00 : f32
    %6 = vector.broadcast %cst_5 : f32 to vector<16x5xf32>
    %7 = arith.maximumf %5, %6 : vector<16x5xf32>
    %c0_6 = arith.constant 0 : index
    %c0_7 = arith.constant 0 : index
    %8 = vector.load %arg4[%c0_6, %c0_7] : memref<5x10xf32, #tpu.memory_space<vmem>>, vector<5x10xf32>
    %cst_8 = arith.constant dense<0.000000e+00> : vector<16x10xf32>
    %9 = tpu.matmul %7, %8, %cst_8 {dimension_numbers = #tpu.dot_dimension_numbers<[1], [0], [0], [1], [0, 0, 1, 1], [], []>} : vector<16x5xf32>, vector<5x10xf32>, vector<16x10xf32> -> vector<16x10xf32>
    %c0_9 = arith.constant 0 : index
    %c0_10 = arith.constant 0 : index
    %10 = vector.load %arg5[%c0_9, %c0_10] : memref<1x10xf32, #tpu.memory_space<vmem>>, vector<1x10xf32>
    %11 = vector.broadcast %10 : vector<1x10xf32> to vector<16x10xf32>
    %12 = arith.addf %9, %11 : vector<16x10xf32>
    %cst_11 = arith.constant 0.000000e+00 : f32
    %13 = vector.broadcast %cst_11 : f32 to vector<16x10xf32>
    %14 = arith.maximumf %12, %13 : vector<16x10xf32>
    %c0_12 = arith.constant 0 : index
    %c0_13 = arith.constant 0 : index
    %15 = vector.load %arg6[%c0_12, %c0_13] : memref<10x100xf32, #tpu.memory_space<vmem>>, vector<10x100xf32>
    %cst_14 = arith.constant dense<0.000000e+00> : vector<16x100xf32>
    %16 = tpu.matmul %14, %15, %cst_14 {dimension_numbers = #tpu.dot_dimension_numbers<[1], [0], [0], [1], [0, 0, 1, 1], [], []>} : vector<16x10xf32>, vector<10x100xf32>, vector<16x100xf32> -> vector<16x100xf32>
    %c0_15 = arith.constant 0 : index
    %c0_16 = arith.constant 0 : index
    %17 = vector.load %arg7[%c0_15, %c0_16] : memref<1x100xf32, #tpu.memory_space<vmem>>, vector<1x100xf32>
    %18 = vector.broadcast %17 : vector<1x100xf32> to vector<16x100xf32>
    %19 = arith.addf %16, %18 : vector<16x100xf32>
    %c0_17 = arith.constant 0 : index
    %c0_18 = arith.constant 0 : index
    %20 = vector.load %arg8[%c0_17, %c0_18] : memref<16x100xf32, #tpu.memory_space<vmem>>, vector<16x100xf32>
    tpu.vector_store %arg8[%c0_17, %c0_18], %19 {strides = array<i32>} : memref<16x100xf32, #tpu.memory_space<vmem>>, vector<16x100xf32>,
    return
  }
  func.func @transform_0(%arg0: i32) -> (i32, i32) {
    %c0_i32 = arith.constant 0 : i32
    %c0_i32_0 = arith.constant 0 : i32
    return %arg0, %c0_i32 : i32, i32
  }
  func.func @transform_1(%arg0: i32) -> (i32, i32) {
    %c0_i32 = arith.constant 0 : i32
    %c0_i32_0 = arith.constant 0 : i32
    %c0_i32_1 = arith.constant 0 : i32
    return %c0_i32, %c0_i32_0 : i32, i32
  }
  func.func @transform_2(%arg0: i32) -> (i32, i32) {
    %c0_i32 = arith.constant 0 : i32
    %c0_i32_0 = arith.constant 0 : i32
    %c0_i32_1 = arith.constant 0 : i32
    return %c0_i32, %c0_i32_0 : i32, i32
  }
  func.func @transform_3(%arg0: i32) -> (i32, i32) {
    %c0_i32 = arith.constant 0 : i32
    %c0_i32_0 = arith.constant 0 : i32
    %c0_i32_1 = arith.constant 0 : i32
    return %c0_i32, %c0_i32_0 : i32, i32
  }
  func.func @transform_4(%arg0: i32) -> (i32, i32) {
    %c0_i32 = arith.constant 0 : i32
    %c0_i32_0 = arith.constant 0 : i32
    %c0_i32_1 = arith.constant 0 : i32
    return %c0_i32, %c0_i32_0 : i32, i32
  }
  func.func @transform_5(%arg0: i32) -> (i32, i32) {
    %c0_i32 = arith.constant 0 : i32
    %c0_i32_0 = arith.constant 0 : i32
    %c0_i32_1 = arith.constant 0 : i32
    return %c0_i32, %c0_i32_0 : i32, i32
  }
  func.func @transform_6(%arg0: i32) -> (i32, i32) {
    %c0_i32 = arith.constant 0 : i32
    %c0_i32_0 = arith.constant 0 : i32
    %c0_i32_1 = arith.constant 0 : i32
    return %c0_i32, %c0_i32_0 : i32, i32
  }
  func.func @transform_7(%arg0: i32) -> (i32, i32) {
    %c0_i32 = arith.constant 0 : i32
    %c0_i32_0 = arith.constant 0 : i32
    return %arg0, %c0_i32 : i32, i32
  }
}

</mosaic_0001>

<bundles_post_ra>
// kernel: tpu_custom_call.1
= control target key start
LH: loop header
LB: loop body
LE: loop exit
PB: predicated region body
PF: predicated region fallthrough
CT: control target
= control target key end

     0   :  { %s410_s0 = inlined_call_operand.vmem [shape: f32[16,200], index: 0, kind: input, shape index: {}]   ;;  %s411_s1 = inlined_call_operand.vmem [shape: f32[200,5], index: 1, kind: input, shape index: {}]   ;;  %s412_s2 = inlined_call_operand.vmem [shape: f32[1,5], index: 2, kind: input, shape index: {}]   ;;  %s413_s3 = inlined_call_operand.vmem [shape: f32[5,10], index: 3, kind: input, shape index: {}]   ;;  %s414_s4 = inlined_call_operand.vmem [shape: f32[1,10], index: 4, kind: input, shape index: {}]   ;;  %s415_s5 = inlined_call_operand.vmem [shape: f32[10,100], index: 5, kind: input, shape index: {}]   ;;  %s416_s6 = inlined_call_operand.vmem [shape: f32[1,100], index: 6, kind: input, shape index: {}]   ;;  %s417_s7 = inlined_call_operand.hbm [shape: f32[16,100], index: 7, kind: output, shape index: {}]  }
   0x1   :  { %v46_v0 = vld [vmem:[%s411_s1 + $0x78] sm:$0xff]  ;;  %v45_v1 = vld [vmem:[%s411_s1 + $0x70] sm:$0xff]  ;;  %v44_v2 = vld [vmem:[%s411_s1 + $0x68] sm:$0xff] }
   0x2   :  { %67 = vmatpush.msra.mxu0 %v46_v0  ;;  %v55_v3 = vld [vmem:[%s411_s1 + $0xc0] sm:$0xff]  ;;  %v54_v4 = vld [vmem:[%s411_s1 + $0xb8] sm:$0xff]  ;;  %v53_v6 = vld [vmem:[%s411_s1 + $0xb0] sm:$0xff] }
   0x3   :  { %v43_v5 = vld [vmem:[%s411_s1 + $0x60] sm:$0xff]  ;;  %97 = vmatpush.msra.mxu1 %v55_v3  ;;  %v42_v7 = vld [vmem:[%s411_s1 + $0x58] sm:$0xff]  ;;  %v52_v8 = vld [vmem:[%s411_s1 + $0xa8] sm:$0xff] }
   0x4   :  { %68 = vmatpush.msra.mxu0 %v45_v1  ;;  %v41_v9 = vld [vmem:[%s411_s1 + $0x50] sm:$0xff]  ;;  %v51_v10 = vld [vmem:[%s411_s1 + $0xa0] sm:$0xff]  ;;  %v40_v11 = vld [vmem:[%s411_s1 + $0x48] sm:$0xff] }
   0x5   :  { %98 = vmatpush.msra.mxu1 %v54_v4  ;;  %v50_v12 = vld [vmem:[%s411_s1 + $0x98] sm:$0xff] }
   0x6   :  { %69 = vmatpush.msra.mxu0 %v44_v2 }
   0x7   :  { %99 = vmatpush.msra.mxu1 %v53_v6 }
   0x8   :  { %70 = vmatpush.msra.mxu0 %v43_v5 }
   0x9   :  { %100 = vmatpush.msra.mxu1 %v52_v8 }
   0xa   :  { %71 = vmatpush.msra.mxu0 %v42_v7 }
   0xc   :  { %72 = vmatpush.msra.mxu0 %v41_v9 }
   0xd   :  { %12 = vsyncpa [#allocation3], 0  ;;  %v39_v13 = vld [vmem:[%s411_s1 + $0x40] sm:$0xff]  ;;  %101 = vmatpush.msra.mxu1 %v51_v10  ;;  %v49_v14 = vld [vmem:[%s411_s1 + $0x90] sm:$0xff]  ;;  %vm60_vm0 = vcmask 588800   ;;  %vm127_vm1 = vcmask 1044480  }
   0xe   :  { %73 = vmatpush.msra.mxu0 %v40_v11  ;;  %v38_v15 = vld [vmem:[%s411_s1 + $0x38] sm:$0xff]  ;;  %v48_v16 = vld [vmem:[%s411_s1 + $0x88] sm:$0xff]  ;;  %v37_v17 = vld [vmem:[%s411_s1 + $0x30] sm:$0xff]  ;;  %vm120_vm2 = vcmask 39936   ;;  %vm169_vm3 = vcmask 1041408   ;;  %vm162_vm4 = vcmask 80896  }
   0xf   :  { %102 = vmatpush.msra.mxu1 %v50_v12  ;;  %v47_v18 = vld [vmem:[%s411_s1 + $0x80] sm:$0xff]  ;;  %v36_v19 = vld [vmem:[%s411_s1 + $0x28] sm:$0xff]  ;;  %v34_v22 = vld [vmem:[%s411_s1 + $0x18] sm:$0xff]  ;;  %vm196_vm5 = vcmask 818176   ;;  %s205_s23 = sshll.u32 %s417_s7, 4  ;;  %s258_s24 = smov 128   ;;  %s206_s23 = int_to_ptr.hbm [resolvable:$true] %s205_s23 }
  0x10   :  { %74 = vmatpush.msra.mxu0 %v39_v13  ;;  %v28_v20 = vld [vmem:[%s410_s0 + $0x8] sm:$0xff]  ;;  %v35_v21 = vld [vmem:[%s411_s1 + $0x20] sm:$0xff]  ;;  %v33_v23 = vld [vmem:[%s411_s1 + $0x10] sm:$0xff]  ;;  %s259_s25 = smov 8  }
  0x11   :  { %103 = vmatpush.msra.mxu1 %v49_v14  ;;  %v32_v24 = vld [vmem:[%s411_s1 + $0x8] sm:$0xff]  ;;  %v30_v25 = vld [vmem:[%s410_s0 + $0x18] sm:$0xff]  ;;  %v31_v26 = vld [vmem:[%s411_s1] sm:$0xff] }
  0x12   :  { %75 = vmatpush.msra.mxu0 %v38_v15  ;;  %v27_v27 = vld [vmem:[%s410_s0] sm:$0xff]  ;;  %v29_v28 = vld [vmem:[%s410_s0 + $0x10] sm:$0xff]  ;;  %v157_v41 = vld [vmem:[%s415_s5 + $0x8] sm:$0x3] }
  0x13   :  { %104 = vmatpush.msra.mxu1 %v48_v16  ;;  %v115_v29 = vld [vmem:[%s413_s3] sm:$0x1f]  ;;  %222 = vmatpush.msk.msra.mxu3 %vm169_vm3, %v157_v41 }
  0x14   :  { %76 = vmatpush.msra.mxu0 %v37_v17  ;;  %219 = vmatpush.msk.msra.mxu2 %vm127_vm1, %v115_v29  ;;  %v228_v30 = vld [vmem:[%s412_s2] ss:$0 sm:$0xff] }
  0x15   :  { %105 = vmatpush.msra.mxu1 %v47_v18  ;;  %v156_v42 = vld [vmem:[%s415_s5] sm:$0xff]  ;;  %s257_s5 = smov [#allocation2]  }
  0x16   :  { %77 = vmatpush.msra.mxu0 %v36_v19  ;;  %217 = vmatmul.msk.f32.vlgmr.msra.gmra.mxu1 %vm60_vm0, %v28_v20  ;;  %v229_v43 = vld [vmem:[%s414_s4] ss:$0 sm:$0xff]  ;;  %s203_s21 = sshll.u32 %s257_s5, 4  ;;  %s204_s21 = int_to_ptr.vmem [resolvable:$true] %s203_s21 }
  0x17   :  { %188 = vmatpush.msra.mxu3 %v156_v42  ;;  %v230_v50 = vld [vmem:[%s416_s6] ss:$0 sm:$0xff] }
  0x18   :  { %78 = vmatpush.msra.mxu0 %v35_v21 }
  0x1a   :  { %79 = vmatpush.msra.mxu0 %v34_v22 }
  0x1c   :  { %80 = vmatpush.msra.mxu0 %v33_v23 }
  0x1e   :  { %81 = vmatpush.msra.mxu0 %v32_v24  ;;  %218 = vmatmul.msk.f32.gmra.mxu1 %vm60_vm0, %v30_v25 }
  0x20   :  { %82 = vmatpush.msra.mxu0 %v31_v26 }
  0x21   :  { %83 = vmatmul.f32.vlgmr.msra.gmra.mxu0 %v27_v27 }
  0x29   :  { %86 = vmatmul.f32.gmra.mxu0 %v29_v28 }
  0x93   :  { %v107_v31 = vpop.f32.mrf.mxu1 }
  0x9b   :  { %v110_v37 = vpop.f32.mrf.mxu1 }
  0x9e   :  { %v84_v32 = vpop.f32.mrf.mxu0 }
  0x9f   :  { %v85_v33 = vadd.f32 %v228_v30, %v84_v32 }
  0xa1   :  { %v108_v34 = vadd.f32 %v107_v31, %v85_v33 }
  0xa3   :  { %v113_v35 = vmax.f32 %v108_v34, 0.0 }
  0xa5   :  { %220 = vmatmul.msk.f32.vlgmr.msra.gmra.mxu2 %vm120_vm2, %v113_v35 }
  0xa6   :  { %v87_v36 = vpop.f32.mrf.mxu0 }
  0xa7   :  { %v88_v38 = vadd.f32 %v228_v30, %v87_v36 }
  0xa9   :  { %v111_v39 = vadd.f32 %v110_v37, %v88_v38 }
  0xab   :  { %v114_v40 = vmax.f32 %v111_v39, 0.0 }
  0xad   :  { %221 = vmatmul.msk.f32.gmra.mxu2 %vm120_vm2, %v114_v40 }
 0x128   :  { %v148_v44 = vpop.f32.mrf.mxu2 }
 0x129   :  { %v149_v45 = vadd.f32 %v229_v43, %v148_v44 }
 0x12b   :  { %v154_v46 = vmax.f32 %v149_v45, 0.0 }
 0x12d   :  { %223 = vmatmul.msk.f32.vlgmr.msra.gmra.mxu3 %vm162_vm4, %v154_v46 }
 0x130   :  { %v151_v47 = vpop.f32.mrf.mxu2 }
 0x131   :  { %v152_v48 = vadd.f32 %v229_v43, %v151_v47 }
 0x133   :  { %v155_v49 = vmax.f32 %v152_v48, 0.0 }
 0x135   :  { %224 = vmatmul.msk.f32.gmra.mxu3 %vm162_vm4, %v155_v49 }
 0x1b0   :  { %v190_v51 = vpop.f32.mrf.mxu3 }
 0x1b1   :  { %v191_v52 = vadd.f32 %v230_v50, %v190_v51 }
 0x1b3   :  { %197 = vst.msk [vmem:[#allocation2] sm:$0xff] %vm196_vm5, %v191_v52 }
 0x1b8   :  { %v193_v53 = vpop.f32.mrf.mxu3 }
 0x1b9   :  { %v194_v54 = vadd.f32 %v230_v50, %v193_v53 }
 0x1bb   :  { %198 = vst.msk [vmem:[#allocation2 + $0x8] sm:$0xff] %vm196_vm5, %v194_v54 }
 0x1bc   :  { %211 = dma.vmem_to_hbm [thread:$0]  %s204_s21, 256, %s206_s23, [#allocation3], %s258_s24, %s258_s24, %s259_s25  }
 0x1bd   :  { %255 = dma.done.wait [#allocation3], 256  }
 0x1be   :  { %256 = vsyncadd [#allocation3], 4294967040 }
 0x1bf   :  { %216 = vsyncpa [#allocation3], 1 }

</bundles_post_ra>
